<compile_context>
chip_gen: v5e
topology: v5e:2x2
jax: 0.10.0
libtpu: 0.0.40
codegen_flags: <defaults>
</compile_context>

<pallas_src>
import functools
import math

import jax
import jax.numpy as jnp
from jax.experimental import pallas as pl
from jax.experimental.pallas import tpu as pltpu


def transformer_block_kernel(x_ref, wqkv_ref, bqkv_ref, wo_ref, bo_ref,
                             ln_g_ref, ln_b_ref, w1_ref, b1_ref, w2_ref, b2_ref,
                             out_ref, *, nhead):
    # x_ref block: (1, S, D)  -- one batch element per grid step.
    _, S, D = x_ref.shape
    H = nhead
    Dh = D // H
    scale = 1.0 / math.sqrt(Dh)

    x = x_ref[0, :, :].astype(jnp.float32)          # (S, D) residual kept in f32
    x_bf = x.astype(jnp.bfloat16)

    # ---------------- fused QKV projection (one wide MXU matmul) -------------
    # wqkv_ref is pre-transposed to (D, 3D) in the wrapper -> plain matmul.
    qkv = jnp.dot(x_bf, wqkv_ref[...],
                  preferred_element_type=jnp.float32) + bqkv_ref[...]   # (S, 3D)

    q = (qkv[:, 0 * D:1 * D] * scale).astype(jnp.bfloat16)   # (S, D)
    k = qkv[:, 1 * D:2 * D].astype(jnp.bfloat16)
    v = qkv[:, 2 * D:3 * D].astype(jnp.bfloat16)

    # ---------------- head-batched self attention ----------------------------
    # (H, S, Dh) operands with the head as a leading batch dim.
    qh = jnp.stack([q[:, h * Dh:(h + 1) * Dh] for h in range(H)], axis=0)
    kh = jnp.stack([k[:, h * Dh:(h + 1) * Dh] for h in range(H)], axis=0)
    vh = jnp.stack([v[:, h * Dh:(h + 1) * Dh] for h in range(H)], axis=0)

    s = jnp.einsum('hqd,hkd->hqk', qh, kh,
                   preferred_element_type=jnp.float32)        # (H, S, S) f32
    s = s - jnp.max(s, axis=-1, keepdims=True)
    p = jnp.exp(s)
    p = p * pl.reciprocal(jnp.sum(p, axis=-1, keepdims=True), approx=True)
    ctx = jnp.einsum('hqk,hkd->hqd', p.astype(jnp.bfloat16), vh,
                     preferred_element_type=jnp.float32)      # (H, S, Dh)

    # Concatenate heads back to a lane-dense (S, D) tensor and do ONE
    # full-width out-projection (wo_ref pre-transposed to (D, D) "in x out").
    ctx = jnp.concatenate([ctx[h] for h in range(H)], axis=-1)        # (S, D)
    attn = jnp.dot(ctx.astype(jnp.bfloat16), wo_ref[...],
                   preferred_element_type=jnp.float32) + bo_ref[...]  # (S, D)

    g = ln_g_ref[...]
    bln = ln_b_ref[...]

    def layer_norm(h):
        mu = jnp.mean(h, axis=-1, keepdims=True)
        var = jnp.mean(jnp.square(h - mu), axis=-1, keepdims=True)
        return (h - mu) * jax.lax.rsqrt(var + 1e-5) * g + bln

    # residual + (shared) LayerNorm.  dropout == identity (eval mode).
    h1 = layer_norm(x + attn)                                          # f32

    # ---------------- feed forward (two wide matmuls) ------------------------
    f = jnp.dot(h1.astype(jnp.bfloat16), w1_ref[...],
                preferred_element_type=jnp.float32) + b1_ref[...]      # (S, DFF)
    f = jnp.maximum(f, 0.0)
    ff = jnp.dot(f.astype(jnp.bfloat16), w2_ref[...],
                 preferred_element_type=jnp.float32) + b2_ref[...]     # (S, D)

    out = layer_norm(h1 + ff)
    out_ref[0, :, :] = out.astype(out_ref.dtype)


def transformer_block(x_sbd, params, nhead):
    """x_sbd: [S, B, D] (PyTorch seq-first layout). Returns [S, B, D]."""
    S, B, D = x_sbd.shape
    DFF = params['w1'].shape[0]
    assert D % nhead == 0, "d_model must be divisible by nhead"

    # One-time parameter layout prep (in a real model this happens at weight
    # load time, not per call): torch (out, in) -> (in, out), bf16 operands.
    wqkv_t = jnp.transpose(params['wqkv']).astype(jnp.bfloat16)   # (D, 3D)
    wo_t = jnp.transpose(params['wo']).astype(jnp.bfloat16)       # (D, D)
    w1_t = jnp.transpose(params['w1']).astype(jnp.bfloat16)       # (D, DFF)
    w2_t = jnp.transpose(params['w2']).astype(jnp.bfloat16)       # (DFF, D)

    # TODO(synk): accept batch_first data at the API boundary (or fold this
    # permutation into the BlockSpec index_map) to avoid the HBM round trip.
    x = jnp.transpose(x_sbd, (1, 0, 2))                            # [B, S, D]

    kernel = functools.partial(transformer_block_kernel, nhead=nhead)

    # Advisory cost estimate for XLA's scheduler.
    flops = (2 * B * S * D * 3 * D          # qkv projection
             + 4 * B * S * S * D            # scores + PV
             + 2 * B * S * D * D            # out projection
             + 4 * B * S * D * DFF)         # FFN
    transcendentals = B * nhead * S * S + B * nhead * S + 2 * B * S
    bytes_accessed = (4 * 2 * B * S * D                                   # x + out (f32)
                      + 2 * (wqkv_t.size + wo_t.size + w1_t.size + w2_t.size)  # bf16 weights
                      + 4 * (3 * D + D + D + D + DFF + D))                # f32 biases/LN

    grid = (B,)
    in_specs = [
        pl.BlockSpec((1, S, D), lambda b: (b, 0, 0)),      # x: pipelined per batch
        pl.BlockSpec((D, 3 * D), lambda b: (0, 0)),        # wqkv_t (resident)
        pl.BlockSpec((1, 3 * D), lambda b: (0, 0)),        # bqkv
        pl.BlockSpec((D, D), lambda b: (0, 0)),            # wo_t
        pl.BlockSpec((1, D), lambda b: (0, 0)),            # bo
        pl.BlockSpec((1, D), lambda b: (0, 0)),            # ln_g
        pl.BlockSpec((1, D), lambda b: (0, 0)),            # ln_b
        pl.BlockSpec((D, DFF), lambda b: (0, 0)),          # w1_t
        pl.BlockSpec((1, DFF), lambda b: (0, 0)),          # b1
        pl.BlockSpec((DFF, D), lambda b: (0, 0)),          # w2_t
        pl.BlockSpec((1, D), lambda b: (0, 0)),            # b2
    ]
    out_specs = pl.BlockSpec((1, S, D), lambda b: (b, 0, 0))

    out = pl.pallas_call(
        kernel,
        out_shape=jax.ShapeDtypeStruct((B, S, D), x.dtype),
        grid=grid,
        in_specs=in_specs,
        out_specs=out_specs,
        compiler_params=pltpu.CompilerParams(
            dimension_semantics=("parallel",),        # megacore-shard batches (v7x)
            vmem_limit_bytes=32 * 1024 * 1024),
        cost_estimate=pl.CostEstimate(
            flops=int(flops),
            transcendentals=int(transcendentals),
            bytes_accessed=int(bytes_accessed)),
    )(x, wqkv_t, params['bqkv'], wo_t, params['bo'],
      params['ln_g'], params['ln_b'], w1_t, params['b1'], w2_t, params['b2'])

    return jnp.transpose(out, (1, 0, 2))               # back to [S, B, D]


def reference_block(x_sbd, params, nhead):
    """Pure-JAX f32 reference replicating the PyTorch forward (eval mode)."""
    S, B, D = x_sbd.shape
    H, Dh = nhead, D // nhead
    x = jnp.transpose(x_sbd, (1, 0, 2)).astype(jnp.float32)      # (B,S,D)
    qkv = x @ params['wqkv'].T + params['bqkv'][0]
    q, k, v = qkv[..., :D], qkv[..., D:2 * D], qkv[..., 2 * D:]

    def split(t):  # (B,S,D) -> (B,H,S,Dh)
        return t.reshape(B, S, H, Dh).transpose(0, 2, 1, 3)

    qh, kh, vh = split(q), split(k), split(v)
    s = jnp.einsum('bhqd,bhkd->bhqk', qh, kh) / math.sqrt(Dh)
    p = jax.nn.softmax(s, axis=-1)
    o = jnp.einsum('bhqk,bhkd->bhqd', p, vh)
    o = o.transpose(0, 2, 1, 3).reshape(B, S, D)
    attn = o @ params['wo'].T + params['bo'][0]

    def ln(h):
        mu = jnp.mean(h, axis=-1, keepdims=True)
        var = jnp.mean((h - mu) ** 2, axis=-1, keepdims=True)
        return (h - mu) * jax.lax.rsqrt(var + 1e-5) * params['ln_g'][0] + params['ln_b'][0]

    h1 = ln(x + attn)
    ff = jnp.maximum(h1 @ params['w1'].T + params['b1'][0], 0.0) @ params['w2'].T + params['b2'][0]
    out = ln(h1 + ff)
    return jnp.transpose(out, (1, 0, 2))


if __name__ == "__main__":
    S, B, D, H, DFF = 8, 2, 32, 4, 64

    key = jax.random.PRNGKey(0)
    ks = jax.random.split(key, 8)
    scale = 0.1
    params = {
        # nn.MultiheadAttention packed in_proj: (3D, D) / (3D,)
        'wqkv': scale * jax.random.normal(ks[0], (3 * D, D), jnp.float32),
        'bqkv': scale * jax.random.normal(ks[1], (1, 3 * D), jnp.float32),
        # out_proj: (D, D) / (D,)
        'wo': scale * jax.random.normal(ks[2], (D, D), jnp.float32),
        'bo': scale * jax.random.normal(ks[3], (1, D), jnp.float32),
        # shared LayerNorm (PyTorch default init: ones / zeros)
        'ln_g': jnp.ones((1, D), jnp.float32),
        'ln_b': jnp.zeros((1, D), jnp.float32),
        # feed-forward: Linear(D, DFF), Linear(DFF, D) (torch weight layout: out x in)
        'w1': scale * jax.random.normal(ks[4], (DFF, D), jnp.float32),
        'b1': scale * jax.random.normal(ks[5], (1, DFF), jnp.float32),
        'w2': scale * jax.random.normal(ks[6], (D, DFF), jnp.float32),
        'b2': scale * jax.random.normal(ks[7], (1, D), jnp.float32),
    }

    x = jax.random.normal(jax.random.PRNGKey(1), (S, B, D), jnp.float32)

    out = transformer_block(x, params, nhead=H)
    out = jax.block_until_ready(out)

    ref = reference_block(x, params, nhead=H)
    assert out.shape == (S, B, D)
    # Tolerance relaxed vs. the f32 reference because matmul operands are bf16
    # (f32 accumulation); observed error is O(1e-3)..O(1e-2).
    assert jnp.allclose(out, ref, atol=2e-2, rtol=2e-2), "kernel mismatch vs reference"

    print("KERNEL_OK")
</pallas_src>

<mosaic_0001>
module attributes {stable_mosaic.version = 11 : i64} {
  func.func @transformer_block_kernel(%arg0: i32, %arg1: memref<1x8x32xf32, #tpu.memory_space<vmem>>, %arg2: memref<32x96xbf16, #tpu.memory_space<vmem>>, %arg3: memref<1x96xf32, #tpu.memory_space<vmem>>, %arg4: memref<32x32xbf16, #tpu.memory_space<vmem>>, %arg5: memref<1x32xf32, #tpu.memory_space<vmem>>, %arg6: memref<1x32xf32, #tpu.memory_space<vmem>>, %arg7: memref<1x32xf32, #tpu.memory_space<vmem>>, %arg8: memref<32x64xbf16, #tpu.memory_space<vmem>>, %arg9: memref<1x64xf32, #tpu.memory_space<vmem>>, %arg10: memref<64x32xbf16, #tpu.memory_space<vmem>>, %arg11: memref<1x32xf32, #tpu.memory_space<vmem>>, %arg12: memref<1x8x32xf32, #tpu.memory_space<vmem>>) attributes {dimension_semantics = [#tpu.dimension_semantics<parallel>], iteration_bounds = array<i64: 2>, scalar_prefetch = 0 : i64, scratch_operands = 0 : i64, tpu.core_type = #tpu.core_type<tc>, window_params = [{transform_indices = @transform_0, window_bounds = array<i64: 1, 8, 32>}, {pipeline_mode = #tpu.pipeline_mode<synchronous>, transform_indices = @transform_1, window_bounds = array<i64: 32, 96>}, {pipeline_mode = #tpu.pipeline_mode<synchronous>, transform_indices = @transform_2, window_bounds = array<i64: 1, 96>}, {pipeline_mode = #tpu.pipeline_mode<synchronous>, transform_indices = @transform_3, window_bounds = array<i64: 32, 32>}, {pipeline_mode = #tpu.pipeline_mode<synchronous>, transform_indices = @transform_4, window_bounds = array<i64: 1, 32>}, {pipeline_mode = #tpu.pipeline_mode<synchronous>, transform_indices = @transform_5, window_bounds = array<i64: 1, 32>}, {pipeline_mode = #tpu.pipeline_mode<synchronous>, transform_indices = @transform_6, window_bounds = array<i64: 1, 32>}, {pipeline_mode = #tpu.pipeline_mode<synchronous>, transform_indices = @transform_7, window_bounds = array<i64: 32, 64>}, {pipeline_mode = #tpu.pipeline_mode<synchronous>, transform_indices = @transform_8, window_bounds = array<i64: 1, 64>}, {pipeline_mode = #tpu.pipeline_mode<synchronous>, transform_indices = @transform_9, window_bounds = array<i64: 64, 32>}, {pipeline_mode = #tpu.pipeline_mode<synchronous>, transform_indices = @transform_10, window_bounds = array<i64: 1, 32>}, {transform_indices = @transform_11, window_bounds = array<i64: 1, 8, 32>}]} {
    %c0 = arith.constant 0 : index
    %c0_0 = arith.constant 0 : index
    %c0_1 = arith.constant 0 : index
    %0 = vector.load %arg1[%c0, %c0_0, %c0_1] : memref<1x8x32xf32, #tpu.memory_space<vmem>>, vector<1x8x32xf32>
    %1 = vector.shape_cast %0 : vector<1x8x32xf32> to vector<8x32xf32>
    %2 = arith.truncf %1 : vector<8x32xf32> to vector<8x32xbf16>
    %c0_2 = arith.constant 0 : index
    %c0_3 = arith.constant 0 : index
    %3 = vector.load %arg2[%c0_2, %c0_3] : memref<32x96xbf16, #tpu.memory_space<vmem>>, vector<32x96xbf16>
    %cst = arith.constant dense<0.000000e+00> : vector<8x96xf32>
    %4 = tpu.matmul %2, %3, %cst {dimension_numbers = #tpu.dot_dimension_numbers<[1], [0], [0], [1], [0, 0, 1, 1], [], []>} : vector<8x32xbf16>, vector<32x96xbf16>, vector<8x96xf32> -> vector<8x96xf32>
    %c0_4 = arith.constant 0 : index
    %c0_5 = arith.constant 0 : index
    %5 = vector.load %arg3[%c0_4, %c0_5] : memref<1x96xf32, #tpu.memory_space<vmem>>, vector<1x96xf32>
    %6 = vector.broadcast %5 : vector<1x96xf32> to vector<8x96xf32>
    %7 = arith.addf %4, %6 : vector<8x96xf32>
    %8 = vector.extract_strided_slice %7 {offsets = [0, 0], sizes = [8, 32], strides = [1, 1]} : vector<8x96xf32> to vector<8x32xf32>
    %cst_6 = arith.constant 0.353553385 : f32
    %9 = vector.broadcast %cst_6 : f32 to vector<8x32xf32>
    %10 = arith.mulf %8, %9 : vector<8x32xf32>
    %11 = arith.truncf %10 : vector<8x32xf32> to vector<8x32xbf16>
    %12 = vector.extract_strided_slice %7 {offsets = [0, 32], sizes = [8, 32], strides = [1, 1]} : vector<8x96xf32> to vector<8x32xf32>
    %13 = arith.truncf %12 : vector<8x32xf32> to vector<8x32xbf16>
    %14 = vector.extract_strided_slice %7 {offsets = [0, 64], sizes = [8, 32], strides = [1, 1]} : vector<8x96xf32> to vector<8x32xf32>
    %15 = arith.truncf %14 : vector<8x32xf32> to vector<8x32xbf16>
    %16 = vector.extract_strided_slice %11 {offsets = [0, 0], sizes = [8, 8], strides = [1, 1]} : vector<8x32xbf16> to vector<8x8xbf16>
    %17 = vector.extract_strided_slice %11 {offsets = [0, 8], sizes = [8, 8], strides = [1, 1]} : vector<8x32xbf16> to vector<8x8xbf16>
    %18 = vector.extract_strided_slice %11 {offsets = [0, 16], sizes = [8, 8], strides = [1, 1]} : vector<8x32xbf16> to vector<8x8xbf16>
    %19 = vector.extract_strided_slice %11 {offsets = [0, 24], sizes = [8, 8], strides = [1, 1]} : vector<8x32xbf16> to vector<8x8xbf16>
    %20 = vector.shape_cast %16 : vector<8x8xbf16> to vector<1x8x8xbf16>
    %21 = vector.shape_cast %17 : vector<8x8xbf16> to vector<1x8x8xbf16>
    %22 = vector.shape_cast %18 : vector<8x8xbf16> to vector<1x8x8xbf16>
    %23 = vector.shape_cast %19 : vector<8x8xbf16> to vector<1x8x8xbf16>
    %24 = tpu.concatenate %20, %21, %22, %23 in 0 : vector<1x8x8xbf16>, vector<1x8x8xbf16>, vector<1x8x8xbf16>, vector<1x8x8xbf16> -> vector<4x8x8xbf16>
    %25 = vector.extract_strided_slice %13 {offsets = [0, 0], sizes = [8, 8], strides = [1, 1]} : vector<8x32xbf16> to vector<8x8xbf16>
    %26 = vector.extract_strided_slice %13 {offsets = [0, 8], sizes = [8, 8], strides = [1, 1]} : vector<8x32xbf16> to vector<8x8xbf16>
    %27 = vector.extract_strided_slice %13 {offsets = [0, 16], sizes = [8, 8], strides = [1, 1]} : vector<8x32xbf16> to vector<8x8xbf16>
    %28 = vector.extract_strided_slice %13 {offsets = [0, 24], sizes = [8, 8], strides = [1, 1]} : vector<8x32xbf16> to vector<8x8xbf16>
    %29 = vector.shape_cast %25 : vector<8x8xbf16> to vector<1x8x8xbf16>
    %30 = vector.shape_cast %26 : vector<8x8xbf16> to vector<1x8x8xbf16>
    %31 = vector.shape_cast %27 : vector<8x8xbf16> to vector<1x8x8xbf16>
    %32 = vector.shape_cast %28 : vector<8x8xbf16> to vector<1x8x8xbf16>
    %33 = tpu.concatenate %29, %30, %31, %32 in 0 : vector<1x8x8xbf16>, vector<1x8x8xbf16>, vector<1x8x8xbf16>, vector<1x8x8xbf16> -> vector<4x8x8xbf16>
    %34 = vector.extract_strided_slice %15 {offsets = [0, 0], sizes = [8, 8], strides = [1, 1]} : vector<8x32xbf16> to vector<8x8xbf16>
    %35 = vector.extract_strided_slice %15 {offsets = [0, 8], sizes = [8, 8], strides = [1, 1]} : vector<8x32xbf16> to vector<8x8xbf16>
    %36 = vector.extract_strided_slice %15 {offsets = [0, 16], sizes = [8, 8], strides = [1, 1]} : vector<8x32xbf16> to vector<8x8xbf16>
    %37 = vector.extract_strided_slice %15 {offsets = [0, 24], sizes = [8, 8], strides = [1, 1]} : vector<8x32xbf16> to vector<8x8xbf16>
    %38 = vector.shape_cast %34 : vector<8x8xbf16> to vector<1x8x8xbf16>
    %39 = vector.shape_cast %35 : vector<8x8xbf16> to vector<1x8x8xbf16>
    %40 = vector.shape_cast %36 : vector<8x8xbf16> to vector<1x8x8xbf16>
    %41 = vector.shape_cast %37 : vector<8x8xbf16> to vector<1x8x8xbf16>
    %42 = tpu.concatenate %38, %39, %40, %41 in 0 : vector<1x8x8xbf16>, vector<1x8x8xbf16>, vector<1x8x8xbf16>, vector<1x8x8xbf16> -> vector<4x8x8xbf16>
    "tpu.trace_start"() <{level = 10 : i32, message = "hqd,hkd->hqk"}> : () -> ()
    %cst_7 = arith.constant dense<0.000000e+00> : vector<4x8x8xf32>
    %43 = tpu.matmul %24, %33, %cst_7 {dimension_numbers = #tpu.dot_dimension_numbers<[2], [2], [1], [1], [0, 0, 0, 1, 1, 1], [0], [0]>} : vector<4x8x8xbf16>, vector<4x8x8xbf16>, vector<4x8x8xf32> -> vector<4x8x8xf32>
    "tpu.trace_stop"() : () -> ()
    %cst_8 = arith.constant dense<0xFF800000> : vector<4x8xf32>
    %44 = vector.multi_reduction <maximumf>, %43, %cst_8 [2] : vector<4x8x8xf32> to vector<4x8xf32>
    %45 = vector.shape_cast %44 : vector<4x8xf32> to vector<4x8x1xf32>
    %46 = vector.broadcast %45 : vector<4x8x1xf32> to vector<4x8x8xf32>
    %47 = arith.subf %43, %46 : vector<4x8x8xf32>
    %48 = math.exp %47 : vector<4x8x8xf32>
    %cst_9 = arith.constant dense<0.000000e+00> : vector<4x8xf32>
    %49 = vector.multi_reduction <add>, %48, %cst_9 [2] : vector<4x8x8xf32> to vector<4x8xf32>
    %50 = vector.shape_cast %49 : vector<4x8xf32> to vector<4x8x1xf32>
    %51 = tpu.reciprocal %50 {approx = true} : vector<4x8x1xf32> -> vector<4x8x1xf32>
    %52 = vector.broadcast %51 : vector<4x8x1xf32> to vector<4x8x8xf32>
    %53 = arith.mulf %48, %52 : vector<4x8x8xf32>
    %54 = arith.truncf %53 : vector<4x8x8xf32> to vector<4x8x8xbf16>
    "tpu.trace_start"() <{level = 10 : i32, message = "hqk,hkd->hqd"}> : () -> ()
    %cst_10 = arith.constant dense<0.000000e+00> : vector<4x8x8xf32>
    %55 = tpu.matmul %54, %42, %cst_10 {dimension_numbers = #tpu.dot_dimension_numbers<[2], [1], [1], [2], [0, 0, 0, 1, 1, 2], [0], [0]>} : vector<4x8x8xbf16>, vector<4x8x8xbf16>, vector<4x8x8xf32> -> vector<4x8x8xf32>
    "tpu.trace_stop"() : () -> ()
    %56 = vector.extract_strided_slice %55 {offsets = [0, 0, 0], sizes = [1, 8, 8], strides = [1, 1, 1]} : vector<4x8x8xf32> to vector<1x8x8xf32>
    %57 = vector.shape_cast %56 : vector<1x8x8xf32> to vector<8x8xf32>
    %58 = vector.extract_strided_slice %55 {offsets = [1, 0, 0], sizes = [1, 8, 8], strides = [1, 1, 1]} : vector<4x8x8xf32> to vector<1x8x8xf32>
    %59 = vector.shape_cast %58 : vector<1x8x8xf32> to vector<8x8xf32>
    %60 = vector.extract_strided_slice %55 {offsets = [2, 0, 0], sizes = [1, 8, 8], strides = [1, 1, 1]} : vector<4x8x8xf32> to vector<1x8x8xf32>
    %61 = vector.shape_cast %60 : vector<1x8x8xf32> to vector<8x8xf32>
    %62 = vector.extract_strided_slice %55 {offsets = [3, 0, 0], sizes = [1, 8, 8], strides = [1, 1, 1]} : vector<4x8x8xf32> to vector<1x8x8xf32>
    %63 = vector.shape_cast %62 : vector<1x8x8xf32> to vector<8x8xf32>
    %64 = tpu.concatenate %57, %59, %61, %63 in 1 : vector<8x8xf32>, vector<8x8xf32>, vector<8x8xf32>, vector<8x8xf32> -> vector<8x32xf32>
    %65 = arith.truncf %64 : vector<8x32xf32> to vector<8x32xbf16>
    %c0_11 = arith.constant 0 : index
    %c0_12 = arith.constant 0 : index
    %66 = vector.load %arg4[%c0_11, %c0_12] : memref<32x32xbf16, #tpu.memory_space<vmem>>, vector<32x32xbf16>
    %cst_13 = arith.constant dense<0.000000e+00> : vector<8x32xf32>
    %67 = tpu.matmul %65, %66, %cst_13 {dimension_numbers = #tpu.dot_dimension_numbers<[1], [0], [0], [1], [0, 0, 1, 1], [], []>} : vector<8x32xbf16>, vector<32x32xbf16>, vector<8x32xf32> -> vector<8x32xf32>
    %c0_14 = arith.constant 0 : index
    %c0_15 = arith.constant 0 : index
    %68 = vector.load %arg5[%c0_14, %c0_15] : memref<1x32xf32, #tpu.memory_space<vmem>>, vector<1x32xf32>
    %69 = vector.broadcast %68 : vector<1x32xf32> to vector<8x32xf32>
    %70 = arith.addf %67, %69 : vector<8x32xf32>
    %c0_16 = arith.constant 0 : index
    %c0_17 = arith.constant 0 : index
    %71 = vector.load %arg6[%c0_16, %c0_17] : memref<1x32xf32, #tpu.memory_space<vmem>>, vector<1x32xf32>
    %c0_18 = arith.constant 0 : index
    %c0_19 = arith.constant 0 : index
    %72 = vector.load %arg7[%c0_18, %c0_19] : memref<1x32xf32, #tpu.memory_space<vmem>>, vector<1x32xf32>
    %73 = arith.addf %1, %70 : vector<8x32xf32>
    %cst_20 = arith.constant dense<0.000000e+00> : vector<8xf32>
    %74 = vector.multi_reduction <add>, %73, %cst_20 [1] : vector<8x32xf32> to vector<8xf32>
    %75 = vector.shape_cast %74 : vector<8xf32> to vector<8x1xf32>
    %cst_21 = arith.constant 3.200000e+01 : f32
    %76 = vector.broadcast %cst_21 : f32 to vector<8x1xf32>
    %77 = arith.divf %75, %76 : vector<8x1xf32>
    %78 = vector.broadcast %77 : vector<8x1xf32> to vector<8x32xf32>
    %79 = arith.subf %73, %78 : vector<8x32xf32>
    %80 = arith.mulf %79, %79 : vector<8x32xf32>
    %cst_22 = arith.constant dense<0.000000e+00> : vector<8xf32>
    %81 = vector.multi_reduction <add>, %80, %cst_22 [1] : vector<8x32xf32> to vector<8xf32>
    %82 = vector.shape_cast %81 : vector<8xf32> to vector<8x1xf32>
    %cst_23 = arith.constant 3.200000e+01 : f32
    %83 = vector.broadcast %cst_23 : f32 to vector<8x1xf32>
    %84 = arith.divf %82, %83 : vector<8x1xf32>
    %85 = vector.broadcast %77 : vector<8x1xf32> to vector<8x32xf32>
    %86 = arith.subf %73, %85 : vector<8x32xf32>
    %cst_24 = arith.constant 9.99999974E-6 : f32
    %87 = vector.broadcast %cst_24 : f32 to vector<8x1xf32>
    %88 = arith.addf %84, %87 : vector<8x1xf32>
    %89 = math.rsqrt %88 : vector<8x1xf32>
    %90 = vector.broadcast %89 : vector<8x1xf32> to vector<8x32xf32>
    %91 = arith.mulf %86, %90 : vector<8x32xf32>
    %92 = vector.broadcast %71 : vector<1x32xf32> to vector<8x32xf32>
    %93 = arith.mulf %91, %92 : vector<8x32xf32>
    %94 = vector.broadcast %72 : vector<1x32xf32> to vector<8x32xf32>
    %95 = arith.addf %93, %94 : vector<8x32xf32>
    %96 = arith.truncf %95 : vector<8x32xf32> to vector<8x32xbf16>
    %c0_25 = arith.constant 0 : index
    %c0_26 = arith.constant 0 : index
    %97 = vector.load %arg8[%c0_25, %c0_26] : memref<32x64xbf16, #tpu.memory_space<vmem>>, vector<32x64xbf16>
    %cst_27 = arith.constant dense<0.000000e+00> : vector<8x64xf32>
    %98 = tpu.matmul %96, %97, %cst_27 {dimension_numbers = #tpu.dot_dimension_numbers<[1], [0], [0], [1], [0, 0, 1, 1], [], []>} : vector<8x32xbf16>, vector<32x64xbf16>, vector<8x64xf32> -> vector<8x64xf32>
    %c0_28 = arith.constant 0 : index
    %c0_29 = arith.constant 0 : index
    %99 = vector.load %arg9[%c0_28, %c0_29] : memref<1x64xf32, #tpu.memory_space<vmem>>, vector<1x64xf32>
    %100 = vector.broadcast %99 : vector<1x64xf32> to vector<8x64xf32>
    %101 = arith.addf %98, %100 : vector<8x64xf32>
    %cst_30 = arith.constant 0.000000e+00 : f32
    %102 = vector.broadcast %cst_30 : f32 to vector<8x64xf32>
    %103 = arith.maximumf %101, %102 : vector<8x64xf32>
    %104 = arith.truncf %103 : vector<8x64xf32> to vector<8x64xbf16>
    %c0_31 = arith.constant 0 : index
    %c0_32 = arith.constant 0 : index
    %105 = vector.load %arg10[%c0_31, %c0_32] : memref<64x32xbf16, #tpu.memory_space<vmem>>, vector<64x32xbf16>
    %cst_33 = arith.constant dense<0.000000e+00> : vector<8x32xf32>
    %106 = tpu.matmul %104, %105, %cst_33 {dimension_numbers = #tpu.dot_dimension_numbers<[1], [0], [0], [1], [0, 0, 1, 1], [], []>} : vector<8x64xbf16>, vector<64x32xbf16>, vector<8x32xf32> -> vector<8x32xf32>
    %c0_34 = arith.constant 0 : index
    %c0_35 = arith.constant 0 : index
    %107 = vector.load %arg11[%c0_34, %c0_35] : memref<1x32xf32, #tpu.memory_space<vmem>>, vector<1x32xf32>
    %108 = vector.broadcast %107 : vector<1x32xf32> to vector<8x32xf32>
    %109 = arith.addf %106, %108 : vector<8x32xf32>
    %110 = arith.addf %95, %109 : vector<8x32xf32>
    %cst_36 = arith.constant dense<0.000000e+00> : vector<8xf32>
    %111 = vector.multi_reduction <add>, %110, %cst_36 [1] : vector<8x32xf32> to vector<8xf32>
    %112 = vector.shape_cast %111 : vector<8xf32> to vector<8x1xf32>
    %cst_37 = arith.constant 3.200000e+01 : f32
    %113 = vector.broadcast %cst_37 : f32 to vector<8x1xf32>
    %114 = arith.divf %112, %113 : vector<8x1xf32>
    %115 = vector.broadcast %114 : vector<8x1xf32> to vector<8x32xf32>
    %116 = arith.subf %110, %115 : vector<8x32xf32>
    %117 = arith.mulf %116, %116 : vector<8x32xf32>
    %cst_38 = arith.constant dense<0.000000e+00> : vector<8xf32>
    %118 = vector.multi_reduction <add>, %117, %cst_38 [1] : vector<8x32xf32> to vector<8xf32>
    %119 = vector.shape_cast %118 : vector<8xf32> to vector<8x1xf32>
    %cst_39 = arith.constant 3.200000e+01 : f32
    %120 = vector.broadcast %cst_39 : f32 to vector<8x1xf32>
    %121 = arith.divf %119, %120 : vector<8x1xf32>
    %122 = vector.broadcast %114 : vector<8x1xf32> to vector<8x32xf32>
    %123 = arith.subf %110, %122 : vector<8x32xf32>
    %cst_40 = arith.constant 9.99999974E-6 : f32
    %124 = vector.broadcast %cst_40 : f32 to vector<8x1xf32>
    %125 = arith.addf %121, %124 : vector<8x1xf32>
    %126 = math.rsqrt %125 : vector<8x1xf32>
    %127 = vector.broadcast %126 : vector<8x1xf32> to vector<8x32xf32>
    %128 = arith.mulf %123, %127 : vector<8x32xf32>
    %129 = vector.broadcast %71 : vector<1x32xf32> to vector<8x32xf32>
    %130 = arith.mulf %128, %129 : vector<8x32xf32>
    %131 = vector.broadcast %72 : vector<1x32xf32> to vector<8x32xf32>
    %132 = arith.addf %130, %131 : vector<8x32xf32>
    %c0_41 = arith.constant 0 : index
    %c0_42 = arith.constant 0 : index
    %c0_43 = arith.constant 0 : index
    %133 = vector.load %arg12[%c0_41, %c0_42, %c0_43] : memref<1x8x32xf32, #tpu.memory_space<vmem>>, vector<1x8x32xf32>
    %134 = vector.shape_cast %133 : vector<1x8x32xf32> to vector<8x32xf32>
    %135 = vector.shape_cast %132 : vector<8x32xf32> to vector<1x8x32xf32>
    tpu.vector_store %arg12[%c0_41, %c0_42, %c0_43], %135 {strides = array<i32>} : memref<1x8x32xf32, #tpu.memory_space<vmem>>, vector<1x8x32xf32>,
    return
  }
  func.func @transform_0(%arg0: i32) -> (i32, i32, i32) {
    %c0_i32 = arith.constant 0 : i32
    %c0_i32_0 = arith.constant 0 : i32
    %c0_i32_1 = arith.constant 0 : i32
    return %arg0, %c0_i32, %c0_i32_0 : i32, i32, i32
  }
  func.func @transform_1(%arg0: i32) -> (i32, i32) {
    %c0_i32 = arith.constant 0 : i32
    %c0_i32_0 = arith.constant 0 : i32
    %c0_i32_1 = arith.constant 0 : i32
    return %c0_i32, %c0_i32_0 : i32, i32
  }
  func.func @transform_2(%arg0: i32) -> (i32, i32) {
    %c0_i32 = arith.constant 0 : i32
    %c0_i32_0 = arith.constant 0 : i32
    %c0_i32_1 = arith.constant 0 : i32
    return %c0_i32, %c0_i32_0 : i32, i32
  }
  func.func @transform_3(%arg0: i32) -> (i32, i32) {
    %c0_i32 = arith.constant 0 : i32
    %c0_i32_0 = arith.constant 0 : i32
    %c0_i32_1 = arith.constant 0 : i32
    return %c0_i32, %c0_i32_0 : i32, i32
  }
  func.func @transform_4(%arg0: i32) -> (i32, i32) {
    %c0_i32 = arith.constant 0 : i32
    %c0_i32_0 = arith.constant 0 : i32
    %c0_i32_1 = arith.constant 0 : i32
    return %c0_i32, %c0_i32_0 : i32, i32
  }
  func.func @transform_5(%arg0: i32) -> (i32, i32) {
    %c0_i32 = arith.constant 0 : i32
    %c0_i32_0 = arith.constant 0 : i32
    %c0_i32_1 = arith.constant 0 : i32
    return %c0_i32, %c0_i32_0 : i32, i32
  }
  func.func @transform_6(%arg0: i32) -> (i32, i32) {
    %c0_i32 = arith.constant 0 : i32
    %c0_i32_0 = arith.constant 0 : i32
    %c0_i32_1 = arith.constant 0 : i32
    return %c0_i32, %c0_i32_0 : i32, i32
  }
  func.func @transform_7(%arg0: i32) -> (i32, i32) {
    %c0_i32 = arith.constant 0 : i32
    %c0_i32_0 = arith.constant 0 : i32
    %c0_i32_1 = arith.constant 0 : i32
    return %c0_i32, %c0_i32_0 : i32, i32
  }
  func.func @transform_8(%arg0: i32) -> (i32, i32) {
    %c0_i32 = arith.constant 0 : i32
    %c0_i32_0 = arith.constant 0 : i32
    %c0_i32_1 = arith.constant 0 : i32
    return %c0_i32, %c0_i32_0 : i32, i32
  }
  func.func @transform_9(%arg0: i32) -> (i32, i32) {
    %c0_i32 = arith.constant 0 : i32
    %c0_i32_0 = arith.constant 0 : i32
    %c0_i32_1 = arith.constant 0 : i32
    return %c0_i32, %c0_i32_0 : i32, i32
  }
  func.func @transform_10(%arg0: i32) -> (i32, i32) {
    %c0_i32 = arith.constant 0 : i32
    %c0_i32_0 = arith.constant 0 : i32
    %c0_i32_1 = arith.constant 0 : i32
    return %c0_i32, %c0_i32_0 : i32, i32
  }
  func.func @transform_11(%arg0: i32) -> (i32, i32, i32) {
    %c0_i32 = arith.constant 0 : i32
    %c0_i32_0 = arith.constant 0 : i32
    %c0_i32_1 = arith.constant 0 : i32
    return %arg0, %c0_i32, %c0_i32_0 : i32, i32, i32
  }
}

</mosaic_0001>

<bundles_post_ra>
// kernel: tpu_custom_call.1
= control target key start
LH: loop header
LB: loop body
LE: loop exit
PB: predicated region body
PF: predicated region fallthrough
CT: control target
= control target key end

     0   :  { %s1503_s0 = inlined_call_operand.vmem [shape: f32[2,8,32], index: 0, kind: input, shape index: {}]   ;;  %s1504_s1 = inlined_call_operand.vmem [shape: bf16[32,96], index: 1, kind: input, shape index: {}]   ;;  %s1505_s2 = inlined_call_operand.vmem [shape: f32[1,96], index: 2, kind: input, shape index: {}]   ;;  %s1506_s3 = inlined_call_operand.vmem [shape: bf16[32,32], index: 3, kind: input, shape index: {}]   ;;  %s1507_s4 = inlined_call_operand.vmem [shape: f32[1,32], index: 4, kind: input, shape index: {}]   ;;  %s1508_s5 = inlined_call_operand.vmem [shape: f32[1,32], index: 5, kind: input, shape index: {}]   ;;  %s1509_s6 = inlined_call_operand.vmem [shape: f32[1,32], index: 6, kind: input, shape index: {}]   ;;  %s1510_s7 = inlined_call_operand.hbm [shape: bf16[32,64], index: 7, kind: input, shape index: {}]   ;;  %s1511_s8 = inlined_call_operand.vmem [shape: f32[1,64], index: 8, kind: input, shape index: {}]   ;;  %s1512_s9 = inlined_call_operand.vmem [shape: bf16[64,32], index: 9, kind: input, shape index: {}]   ;;  %s1513_s10 = inlined_call_operand.vmem [shape: f32[1,32], index: 10, kind: input, shape index: {}]   ;;  %s1514_s11 = inlined_call_operand.hbm [shape: f32[2,8,32], index: 11, kind: output, shape index: {}]  }
   0x1   :  { %1515 = sst [smem:[#allocation8_spill]] %s1510_s7 }
   0x2   :  { %16 = vsyncpa [#allocation3], 0 }
   0x3   :  { %17 = vsyncpa [#allocation4], 0 }
   0x4   :  { %19 = vsyncpa [#allocation4 + $0x1], 0  ;;  %s1314_s17 = smov 0   ;;  %s1316_s18 = smov 0  }
   0x5   :  { %s1318_s19 = smov 0   ;;  %s1320_s20 = smov 0  }
   0x6 LB: > { %s1335_s21 = sadd.s32 4294967295, %s1240_s20   ;;  %s981_s22 = sadd.s32 4294967294, %s1240_s20   ;;  %s1240_s20 = sphi %s1320_s20, %s1522_s20   ;;  %s1236_s19 = sphi %s1318_s19, %s1521_s19   ;;  %s1232_s18 = sphi %s1316_s18, %s1520_s18   ;;  %s1228_s17 = sphi %s1314_s17, %s1519_s17  }
   0x7   : > { %s1339_s23 = sadd.s32 1, %s1240_s20   ;;  %s268_s24 = sadd.s32 1, %s1236_s19 }
   0x8   : > { %s265_s25 = ssub.s32 %s1240_s20, %s1339_s23  ;;  %p278_p0 = scmp.ne.s32.totalorder %s1236_s19, %s1232_s18 }
   0x9   : > { %p266_p1 = scmp.eq.s32.totalorder %s265_s25, 0  ;;  %p279_p2 = scmp.eq.s32.totalorder %s1335_s21, 1 }
   0xa   : > { %p284_p3 = scmp.ne.s32.totalorder %s1232_s18, %s1228_s17  ;;  %p285_p4 = scmp.eq.s32.totalorder %s981_s22, 1 }
   0xb   : > { %s1350_s26 = scalar_select %p266_p1, %s1236_s19, %s268_s24  }
   0xc   : > { %p1352_p5 = por %p279_p2, %p278_p0  ;;  %p1356_p6 = por %p285_p4, %p284_p3 }
   0xd   : > { %p982_p7 = scmp.ge.s32.totalorder %s1240_s20, 1  ;;  %p292_p8 = scmp.lt.s32.totalorder %s1240_s20, 3 }
   0xe   : > { %p1069_p9 = scmp.eq.s32.totalorder %s1335_s21, 0  ;;  %s1518_s7 = sld [smem:[#allocation8_spill]] }
   0xf   : > { %p293_p10 = pnand %p982_p7, %p292_p8  ;;  %s1242_s13 = smov [#allocation2]  }
  0x10   : > { %s323_s14 = sshll.u32 %s1242_s13, 4  ;;  %s1243_s15 = smov 64   ;;  %s324_s14 = int_to_ptr.vmem [resolvable:$true] %s323_s14 }
  0x11   : > { %p1061_p11 = pneg %p293_p10  ;;  %s1244_s16 = smov 4  }
  0x12   : > { %355 = sbr.rel (%p293_p10) target bundleno = 1989 (0x7c5), region = 64 }
  0x13   : > { %p1062_p12 = pnand %p1069_p9, %p1061_p11 }
  0x14   : > { %s321_s12 = sshll.u32 %s1518_s7, 4  ;;  %s322_s12 = int_to_ptr.hbm [resolvable:$true] %s321_s12 }
  0x15   : > { %1064 = dma.hbm_to_vmem [thread:$0]  (!%p1062_p12), %s322_s12, 256, %s324_s14, [#allocation3], %s1243_s15, %s1243_s15, %s1244_s16  }
  0x17   : > { %1219 = dma.done.wait (%p1069_p9), [#allocation3], 256  }
  0x18   : > { %1221 = vsyncadd (%p1069_p9), [#allocation3], 4294967040  ;;  %p395_p13 = scmp.lt.s32.totalorder %s1335_s21, 1  ;;  %v1046_v0 = vld [vmem:[%s1504_s1 + $0x8] sm:$0xff]  ;;  %v1045_v1 = vld [vmem:[%s1504_s1] sm:$0xff]  ;;  %vm422_vm0 = vcmask 261120  }
  0x19   : > { %432 = vmatpush.bf16.msra.mxu0 %v1046_v0  ;;  %v1116_v4 = vld [vmem:[%s1505_s2] ss:$0 sm:$0xff]  ;;  %s1245_s7 = smov 104   ;;  %s1248_s25 = smov 96   ;;  %vm460_vm1 = vcmask 64512   ;;  %vm602_vm2 = vcmask 1043456  }
  0x1a   : > { %s396_s22 = scalar_select %p395_p13, %s1335_s21, 1  ;;  %vm695_vm3 = vcmask 130048   ;;  %vm697_vm4 = vcmask 195584   ;;  %vm851_vm9 = vcmask 523264  }
  0x1b   : > { %s1249_s29 = smov 64   ;;  %s1251_s13 = smov 8  }
  0x1c   : > { %s988_s24 = sshll.u32 %s396_s22, 3  ;;  %s1246_s22 = smov 120  }
  0x1d   : > { %s398_s30 = scalar_lea.vmem %s1503_s0, %s988_s24  ;;  %433 = vmatpush.bf16.msra.mxu0 %v1045_v1  ;;  %s1247_s24 = smov 112  }
  0x1e   : > { %v1383_v2 = vld [vmem:[%s398_s30] sm:$0xff]  ;;  %s1250_s30 = smov 16   ;;  %s1252_s12 = smov 24  }
  0x1f   : > { %v401_v3 = vpack.c.bf16 %v1383_v2, %v1383_v2  ;;  %s392_s14 = sand.u32 1, %s1232_s18   ;;  %s1042_s16 = sshll.u32 %s1335_s21, 3 }
  0x20   : > { %s987_s15 = sshll.u32 %s392_s14, 3  ;;  %s895_s21 = scalar_lea.sflag [#allocation4], %s392_s14 }
  0x21   : > { %997 = vmatmul.msk.bf16.vlgmr.msra.gmra.mxu0 %vm422_vm0, %v401_v3 }
  0x9e   : > { %v435_v5 = vpop.f32.mrf.mxu0 }
  0x9f   : > { %v436_v6 = vadd.f32 %v1116_v4, %v435_v5 }
  0xa1   : > { %v441_v7 = vpack.c.bf16 %v436_v6, %v436_v6  ;;  %v439_v9 = vmul.f32 0.35355338, %v436_v6 }
  0xa3   : > { %454 = vrot.lane.b32.xlu1 %v441_v7, %s1245_s7  ;;  %450 = vrot.lane.b32.xlu0 %v441_v7, %s1246_s22  ;;  %v440_v10 = vpack.c.bf16 %v439_v9, %v439_v9  ;;  %v456_v11 = vunpack.c.l.b16 %v441_v7 }
  0xa5   : > { %v1392_v12 = vpack.c.b16 %v456_v11, %v456_v11 }
  0xa6   : > { %v437_v8 = vpop.f32.mrf.mxu0 }
  0xab   : > { %452 = vrot.lane.b32.xlu0 %v441_v7, %s1247_s24 }
  0xb3   : > { %445 = vrot.lane.b32.xlu0 %v440_v10, %s1247_s24  ;;  %s905_s24 = scalar_lea.hbm %s1514_s11, %s1042_s16 }
  0xbb   : > { %458 = vrot.lane.b32.xlu0 %v1392_v12, %s1248_s25 }
 0x115   : > { %v451_v13 = vpop.permute.xlu0 %450  ;;  %v455_v16 = vpop.permute.xlu1 %454 }
 0x116   : > { %v480_v14 = vunpack.c.l.b16 %v451_v13  ;;  %v526_v17 = vunpack.c.l.b16 %v455_v16 }
 0x118   : > { %v1395_v15 = vpack.c.b16 %v480_v14, %v480_v14  ;;  %v1398_v20 = vpack.c.b16 %v526_v17, %v526_v17 }
 0x11a   : > { %482 = vrot.lane.b32.xlu1 %v1395_v15, %s1248_s25 }
 0x11d   : > { %v453_v18 = vpop.permute.xlu0 %452 }
 0x11e   : > { %v503_v19 = vunpack.c.l.b16 %v453_v18 }
 0x120   : > { %v504_v21 = vpack.c.b16 %v503_v19, %v503_v19 }
 0x122   : > { %528 = vrot.lane.b32.xlu1 %v1398_v20, %s1248_s25  ;;  %505 = vrot.lane.b32.xlu2 %v504_v21, %s1248_s25  ;;  %s394_s25 = scalar_lea.vmem [#allocation5], %s987_s15  ;;  %s1194_s15 = scalar_lea.hbm %s1514_s11, 16 }
 0x125   : > { %v446_v22 = vpop.permute.xlu0 %445 }
 0x12a   : > { %443 = vrot.lane.b32.xlu2 %v440_v10, %s1246_s22 }
 0x12d   : > { %v459_v23 = vpop.permute.xlu0 %458 }
 0x12e   : > { %v465_v24 = vsel %vm460_vm1, %v459_v23, 0 }
 0x12f   : > { %474 = vmatpush.bf16.xpose.msra.mxu1 %v465_v24 }
 0x132   : > { %447 = vrot.lane.b32.xlu2 %v440_v10, %s1245_s7 }
 0x136   : > { %998 = vmatmul.msk.bf16.vlgmr.msra.gmra.mxu1 %vm460_vm1, %v440_v10 }
 0x17c   : > { %v506_v25 = vpop.permute.xlu2 %505 }
 0x17d   : > { %v511_v26 = vsel %vm460_vm1, %v506_v25, 0 }
 0x17e   : > { %520 = vmatpush.bf16.xpose.msra.mxu3 %v511_v26 }
 0x184   : > { %v444_v29 = vpop.permute.xlu2 %443 }
 0x185   : > { %1000 = vmatmul.msk.bf16.vlgmr.msra.gmra.mxu3 %vm460_vm1, %v446_v22 }
 0x18c   : > { %v483_v27 = vpop.permute.xlu1 %482  ;;  %v448_v32 = vpop.permute.xlu2 %447 }
 0x18d   : > { %v488_v28 = vsel %vm460_vm1, %v483_v27, 0 }
 0x18e   : > { %497 = vmatpush.bf16.xpose.msra.mxu2 %v488_v28 }
 0x194   : > { %v529_v30 = vpop.permute.xlu1 %528 }
 0x195   : > { %999 = vmatmul.msk.bf16.vlgmr.msra.gmra.mxu2 %vm460_vm1, %v444_v29  ;;  %v534_v31 = vsel %vm460_vm1, %v529_v30, 0 }
 0x196   : > { %543 = vmatpush.bf16.xpose.msrb.mxu0 %v534_v31 }
 0x19d   : > { %1001 = vmatmul.msk.bf16.vlgmr.msrb.gmra.mxu0 %vm460_vm1, %v448_v32 }
 0x1b3   : > { %v476_v33 = vpop.f32.mrf.mxu1 }
 0x1b4   : > { %v549_v38 = vsel %vm460_vm1, %v476_v33, -inf }
 0x1bb   : > { %v478_v34 = vpop.f32.mrf.mxu1 }
 0x1bc   : > { %v1048_v34 = vld [vmem:[%s1506_s3 + $0x8] sm:$0xff] }
 0x208   : > { %v522_v35 = vpop.f32.mrf.mxu3 }
 0x209   : > { %v555_v36 = vsel %vm460_vm1, %v522_v35, -inf }
 0x20a   : > { %556 = vmax.xlane.f32.xlu2 %v555_v36 }
 0x210   : > { %v524_v37 = vpop.f32.mrf.mxu3 }
 0x212   : > { %550 = vmax.xlane.f32.xlu2 %v549_v38 }
 0x218   : > { %v499_v39 = vpop.f32.mrf.mxu2 }
 0x219   : > { %v552_v40 = vsel %vm460_vm1, %v499_v39, -inf }
 0x21a   : > { %553 = vmax.xlane.f32.xlu1 %v552_v40  ;;  %v545_v41 = vpop.f32.mrf.mxu0 }
 0x21b   : > { %v558_v42 = vsel %vm460_vm1, %v545_v41, -inf }
 0x21c   : > { %559 = vmax.xlane.f32.xlu0 %v558_v42 }
 0x220   : > { %v501_v43 = vpop.f32.mrf.mxu2 }
 0x221   : > { %v1117_v43 = vld [vmem:[%s1507_s4] ss:$0 sm:$0xff] }
 0x222   : > { %v547_v44 = vpop.f32.mrf.mxu0 }
 0x27d   : > { %v557_v45 = vpop.xlane.xlu2 %556 }
 0x27e   : > { %v563_v46 = vsub.f32 %v522_v35, %v557_v45  ;;  %v1047_v35 = vld [vmem:[%s1506_s3] sm:$0xff] }
 0x280   : > { %v569_v47 = vmul.f32 1.442695, %v563_v46 }
 0x282   : > { %1122 = vpow2.f32 %v569_v47 }
 0x285   : > { %v551_v60 = vpop.xlane.xlu2 %550 }
 0x286   : > { %v561_v61 = vsub.f32 %v476_v33, %v551_v60 }
 0x288   : > { %v1123_v48 = vpop.eup %1122  ;;  %v565_v62 = vmul.f32 1.442695, %v561_v61  ;;  %v1049_v61 = vld [vmem:[#allocation2] sm:$0xff] }
 0x289   : > { %v579_v49 = vsel %vm460_vm1, %v1123_v48, 0.0 }
 0x28a   : > { %580 = vadd.xlane.f32.xlu2 %v579_v49  ;;  %v1253_v49 = vmov 32.0  }
 0x28d   : > { %v554_v50 = vpop.xlane.xlu1 %553 }
 0x28e   : > { %v562_v51 = vsub.f32 %v499_v39, %v554_v50 }
 0x28f   : > { %v560_v52 = vpop.xlane.xlu0 %559 }
 0x290   : > { %v567_v53 = vmul.f32 1.442695, %v562_v51  ;;  %v564_v54 = vsub.f32 %v545_v41, %v560_v52 }
 0x292   : > { %1124 = vpow2.f32 %v567_v53  ;;  %v571_v55 = vmul.f32 1.442695, %v564_v54 }
 0x294   : > { %1126 = vpow2.f32 %v571_v55 }
 0x295   : > { %1128 = vpow2.f32 %v565_v62  ;;  %v1054_v62 = vld [vmem:[%s1512_s9 + $0x18] sm:$0xff] }
 0x298   : > { %v1125_v56 = vpop.eup %1124 }
 0x299   : > { %v576_v57 = vsel %vm460_vm1, %v1125_v56, 0.0 }
 0x29a   : > { %v1127_v58 = vpop.eup %1126  ;;  %577 = vadd.xlane.f32.xlu1 %v576_v57 }
 0x29b   : > { %v582_v59 = vsel %vm460_vm1, %v1127_v58, 0.0  ;;  %v1129_v63 = vpop.eup %1128 }
 0x29c   : > { %583 = vadd.xlane.f32.xlu0 %v582_v59  ;;  %v573_v0 = vsel %vm460_vm1, %v1129_v63, 0.0 }
 0x2a2   : > { %640 = vrot.lane.b32.xlu2 %v504_v21, %s1249_s29 }
 0x2b0   : > { %661 = vrot.lane.b32.xlu0 %v1398_v20, %s1249_s29 }
 0x2b3   : > { %619 = vrot.lane.b32.xlu1 %v1395_v15, %s1249_s29 }
 0x2b8   : > { %597 = vrot.lane.b32.xlu0 %v1392_v12, %s1249_s29  ;;  %s907_s29 = sshll.u32 %s394_s25, 4  ;;  %s908_s29 = int_to_ptr.vmem [resolvable:$true] %s907_s29 }
 0x2dd   : > { %574 = vadd.xlane.f32.xlu1 %v573_v0 }
 0x2fd   : > { %v581_v1 = vpop.xlane.xlu2 %580 }
 0x2fe   : > { %1130 = vrcp.f32 %v581_v1  ;;  %v1053_v1 = vld [vmem:[%s1512_s9 + $0x10] sm:$0xff] }
 0x304   : > { %v1131_v3 = vpop.eup %1130 }
 0x305   : > { %v591_v4 = vmul.f32 %v1131_v3, %v1123_v48  ;;  %v641_v5 = vpop.permute.xlu2 %640 }
 0x306   : > { %v646_v6 = vsel %vm602_vm2, %v641_v5, 0 }
 0x307   : > { %655 = vmatpush.bf16.msrb.mxu3 %v646_v6  ;;  %v595_v7 = vpack.c.bf16 %v591_v4, %v591_v4 }
 0x30a   : > { %1004 = vmatmul.msk.bf16.vlgmr.msrb.gmra.mxu3 %vm460_vm1, %v595_v7 }
 0x30b   : > { %859 = vmatpush.bf16.msra.mxu3 %v1054_v62 }
 0x30d   : > { %v578_v9 = vpop.xlane.xlu1 %577 }
 0x30f   : > { %v584_v8 = vpop.xlane.xlu0 %583  ;;  %860 = vmatpush.bf16.msra.mxu3 %v1053_v1 }
 0x310   : > { %1132 = vrcp.f32 %v584_v8 }
 0x311   : > { %1134 = vrcp.f32 %v578_v9 }
 0x316   : > { %v1133_v10 = vpop.eup %1132 }
 0x317   : > { %v1135_v11 = vpop.eup %1134  ;;  %v592_v12 = vmul.f32 %v1133_v10, %v1127_v58  ;;  %v1118_v10 = vld [vmem:[%s1508_s5] ss:$0 sm:$0xff] }
 0x318   : > { %v590_v15 = vmul.f32 %v1135_v11, %v1125_v56 }
 0x319   : > { %v596_v16 = vpack.c.bf16 %v592_v12, %v592_v12  ;;  %v1119_v12 = vld [vmem:[%s1509_s6] ss:$0 sm:$0xff] }
 0x31a   : > { %v594_v19 = vpack.c.bf16 %v590_v15, %v590_v15 }
 0x322   : > { %v662_v13 = vpop.permute.xlu0 %661 }
 0x323   : > { %v667_v14 = vsel %vm602_vm2, %v662_v13, 0 }
 0x324   : > { %676 = vmatpush.bf16.msra.mxu0 %v667_v14 }
 0x325   : > { %v620_v17 = vpop.permute.xlu1 %619 }
 0x326   : > { %v625_v18 = vsel %vm602_vm2, %v620_v17, 0  ;;  %v1052_v17 = vld [vmem:[%s1512_s9 + $0x8] sm:$0xff] }
 0x327   : > { %634 = vmatpush.bf16.msrb.mxu2 %v625_v18  ;;  %1005 = vmatmul.msk.bf16.vlgmr.msra.gmra.mxu0 %vm460_vm1, %v596_v16  ;;  %v1051_v18 = vld [vmem:[%s1512_s9] sm:$0xff] }
 0x328   : > { %861 = vmatpush.bf16.msra.mxu3 %v1052_v17 }
 0x32a   : > { %1003 = vmatmul.msk.bf16.vlgmr.msrb.gmra.mxu2 %vm460_vm1, %v594_v19  ;;  %v598_v20 = vpop.permute.xlu0 %597  ;;  %v1120_v19 = vld [vmem:[%s1511_s8] ss:$0 sm:$0xff] }
 0x32b   : > { %v604_v21 = vsel %vm602_vm2, %v598_v20, 0 }
 0x32c   : > { %613 = vmatpush.bf16.msrb.mxu1 %v604_v21  ;;  %862 = vmatpush.bf16.msra.mxu3 %v1051_v18 }
 0x330   : > { %729 = vmatpush.bf16.msra.mxu1 %v1048_v34 }
 0x334   : > { %730 = vmatpush.bf16.msra.mxu1 %v1047_v35 }
 0x350   : > { %v575_v22 = vpop.xlane.xlu1 %574 }
 0x351   : > { %1136 = vrcp.f32 %v575_v22 }
 0x352   : > { %1138 = vrcp.f32 %v1253_v49 }
 0x357   : > { %v1137_v23 = vpop.eup %1136 }
 0x358   : > { %v589_v24 = vmul.f32 %v1137_v23, %v1129_v63  ;;  %v1139_v50 = vpop.eup %1138 }
 0x359   : > { %v743_v51 = vmul.f32 32.0, %v1139_v50  ;;  %vm747_vm5 = vweird.f32 %v1139_v50 }
 0x35a   : > { %v593_v25 = vpack.c.bf16 %v589_v24, %v589_v24 }
 0x35b   : > { %v744_v52 = vsub.f32 1.0, %v743_v51 }
 0x35c   : > { %1002 = vmatmul.msk.bf16.vlgmr.msrb.gmra.mxu1 %vm460_vm1, %v593_v25  ;;  %v1121_v25 = vld [vmem:[%s1513_s10] ss:$0 sm:$0xff] }
 0x35d   : > { %v745_v53 = vmul.f32 %v1139_v50, %v744_v52 }
 0x35f   : > { %v746_v54 = vadd.f32 %v1139_v50, %v745_v53 }
 0x361   : > { %v748_v55 = vsel %vm747_vm5, %v1139_v50, %v746_v54 }
 0x38d   : > { %v657_v26 = vpop.f32.mrf.mxu3 }
 0x38e   : > { %687 = vrot.lane.b32.xlu0 %v657_v26, %s1250_s30  ;;  %s909_s30 = sshll.u32 %s905_s24, 4  ;;  %s910_s30 = int_to_ptr.hbm [resolvable:$true] %s909_s30 }
 0x395   : > { %v659_v27 = vpop.f32.mrf.mxu3 }
 0x3a4   : > { %v678_v28 = vpop.f32.mrf.mxu0 }
 0x3ac   : > { %v680_v29 = vpop.f32.mrf.mxu0 }
 0x3ad   : > { %v636_v30 = vpop.f32.mrf.mxu2 }
 0x3ae   : > { %683 = vrot.lane.b32.xlu2 %v636_v30, %s1251_s13  ;;  %s1188_s13 = sshra.s32 %s910_s30, 4  ;;  %s1189_s13 = int_to_ptr.hbm [resolvable:$true] %s1188_s13 }
 0x3af   : > { %p1195_p3 = scmp.lt.s32.totalorder %s1189_s13, %s1514_s11 }
 0x3b5   : > { %v638_v31 = vpop.f32.mrf.mxu2 }
 0x3b6   : > { %691 = vrot.lane.b32.xlu2 %v678_v28, %s1252_s12  ;;  %s1190_s12 = scalar_lea.hbm %s1189_s13, 8 }
 0x3b7   : > { %p1191_p0 = scmp.ne.s32.totalorder %s1189_s13, %s1190_s12  ;;  %p1196_p4 = scmp.lt.s32.totalorder %s1194_s15, %s1190_s12 }
 0x3b9   : > { %p1192_p1 = pnand %p1191_p0, %p1352_p5  ;;  %p1197_p7 = por %p1196_p4, %p1195_p3 }
 0x3bb   : > { %p1193_p2 = pneg %p1192_p1 }
 0x3bd   : > { %p1198_p8 = pnand %p1197_p7, %p1193_p2 }
 0x3d9   : > { %v615_v32 = vpop.f32.mrf.mxu1 }
 0x3e1   : > { %v617_v33 = vpop.f32.mrf.mxu1 }
 0x400   : > { %v688_v38 = vpop.permute.xlu0 %687 }
 0x408   : > { %v684_v36 = vpop.permute.xlu2 %683 }
 0x409   : > { %v694_v37 = vsel %vm460_vm1, %v615_v32, %v684_v36 }
 0x40a   : > { %v696_v39 = vsel %vm695_vm3, %v694_v37, %v688_v38 }
 0x410   : > { %v692_v40 = vpop.permute.xlu2 %691 }
 0x411   : > { %v698_v41 = vsel %vm697_vm4, %v696_v39, %v692_v40 }
 0x412   : > { %v699_v42 = vpack.c.bf16 %v698_v41, %v698_v41 }
 0x414   : > { %1014 = vmatmul.msk.bf16.vlgmr.msra.gmra.mxu1 %vm422_vm0, %v699_v42 }
 0x491   : > { %v732_v44 = vpop.f32.mrf.mxu1 }
 0x492   : > { %v733_v45 = vadd.f32 %v1117_v43, %v732_v44 }
 0x494   : > { %v738_v46 = vadd.f32 %v733_v45, %v1383_v2  ;;  %v1050_v2 = vld [vmem:[#allocation2 + $0x8] sm:$0xff] }
 0x495   : > { %806 = vmatpush.bf16.msra.mxu2 %v1050_v2 }
 0x496   : > { %v739_v47 = vsel %vm422_vm0, %v738_v46, 0.0 }
 0x497   : > { %740 = vadd.xlane.f32.xlu0 %v739_v47 }
 0x499   : > { %v734_v48 = vpop.f32.mrf.mxu1  ;;  %807 = vmatpush.bf16.msra.mxu2 %v1049_v61 }
 0x50a   : > { %v741_v56 = vpop.xlane.xlu0 %740 }
 0x50b   : > { %v749_v57 = vmul.f32 %v748_v55, %v741_v56 }
 0x50d   : > { %v750_v58 = vsub.f32 %v738_v46, %v749_v57 }
 0x50f   : > { %v751_v59 = vmul.f32 %v750_v58, %v750_v58 }
 0x511   : > { %v752_v60 = vsel %vm422_vm0, %v751_v59, 0.0 }
 0x512   : > { %753 = vadd.xlane.f32.xlu2 %v752_v60 }
 0x585   : > { %v754_v63 = vpop.xlane.xlu2 %753 }
 0x586   : > { %v755_v0 = vmul.f32 %v754_v63, %v748_v55 }
 0x588   : > { %v756_v3 = vadd.f32 1e-05, %v755_v0 }
 0x58a   : > { %1140 = vrsqrt.f32 %v756_v3  ;;  %vm763_vm7 = vweird.f32 %v756_v3 }
 0x590   : > { %v1141_v4 = vpop.eup %1140 }
 0x591   : > { %v758_v5 = vmul.f32 %v1141_v4, %v756_v3  ;;  %vm764_vm6 = vweird.f32 %v1141_v4 }
 0x592   : > { %vm765_vm8 = vmor %vm763_vm7, %vm764_vm6 }
 0x593   : > { %v759_v6 = vmul.f32 %v1141_v4, %v758_v5 }
 0x595   : > { %v760_v7 = vmul.f32 0.5, %v759_v6 }
 0x597   : > { %v761_v8 = vsub.f32 1.5, %v760_v7 }
 0x599   : > { %v762_v9 = vmul.f32 %v1141_v4, %v761_v8 }
 0x59b   : > { %v766_v11 = vsel %vm765_vm8, %v1141_v4, %v762_v9 }
 0x59c   : > { %v767_v13 = vmul.f32 %v766_v11, %v750_v58 }
 0x59e   : > { %v771_v14 = vmul.f32 %v1118_v10, %v767_v13 }
 0x5a0   : > { %v775_v15 = vadd.f32 %v1119_v12, %v771_v14 }
 0x5a2   : > { %v776_v16 = vpack.c.bf16 %v775_v15, %v775_v15 }
 0x5a4   : > { %1023 = vmatmul.msk.bf16.vlgmr.msra.gmra.mxu2 %vm422_vm0, %v776_v16 }
 0x627   : > { %v809_v20 = vpop.f32.mrf.mxu2 }
 0x628   : > { %v810_v21 = vadd.f32 %v1120_v19, %v809_v20 }
 0x62a   : > { %v813_v22 = vmax.f32 %v810_v21, 0.0 }
 0x62c   : > { %v814_v23 = vpack.c.bf16 %v813_v22, %v813_v22 }
 0x62e   : > { %1040 = vmatmul.msk.bf16.vlgmr.msra.gmra.mxu3 %vm851_vm9, %v814_v23 }
 0x62f   : > { %v811_v24 = vpop.f32.mrf.mxu2 }
 0x6b1   : > { %v864_v26 = vpop.f32.mrf.mxu3 }
 0x6b2   : > { %v865_v27 = vadd.f32 %v1121_v25, %v864_v26 }
 0x6b4   : > { %v868_v28 = vadd.f32 %v865_v27, %v775_v15 }
 0x6b6   : > { %v869_v29 = vsel %vm422_vm0, %v868_v28, 0.0 }
 0x6b7   : > { %870 = vadd.xlane.f32.xlu1 %v869_v29 }
 0x6b9   : > { %v866_v30 = vpop.f32.mrf.mxu3 }
 0x72a   : > { %v871_v31 = vpop.xlane.xlu1 %870 }
 0x72b   : > { %v872_v32 = vmul.f32 %v871_v31, %v748_v55 }
 0x72d   : > { %v873_v33 = vsub.f32 %v868_v28, %v872_v32 }
 0x72f   : > { %v874_v34 = vmul.f32 %v873_v33, %v873_v33 }
 0x731   : > { %v875_v35 = vsel %vm422_vm0, %v874_v34, 0.0 }
 0x732   : > { %876 = vadd.xlane.f32.xlu1 %v875_v35 }
 0x7a5   : > { %v877_v36 = vpop.xlane.xlu1 %876 }
 0x7a6   : > { %v878_v37 = vmul.f32 %v877_v36, %v748_v55 }
 0x7a8   : > { %v879_v38 = vadd.f32 1e-05, %v878_v37 }
 0x7aa   : > { %1142 = vrsqrt.f32 %v879_v38  ;;  %vm886_vm11 = vweird.f32 %v879_v38 }
 0x7b0   : > { %v1143_v39 = vpop.eup %1142 }
 0x7b1   : > { %v881_v40 = vmul.f32 %v1143_v39, %v879_v38  ;;  %vm887_vm10 = vweird.f32 %v1143_v39 }
 0x7b2   : > { %vm888_vm12 = vmor %vm886_vm11, %vm887_vm10 }
 0x7b3   : > { %v882_v41 = vmul.f32 %v1143_v39, %v881_v40 }
 0x7b5   : > { %v883_v42 = vmul.f32 0.5, %v882_v41 }
 0x7b7   : > { %v884_v43 = vsub.f32 1.5, %v883_v42 }
 0x7b9   : > { %v885_v44 = vmul.f32 %v1143_v39, %v884_v43 }
 0x7bb   : > { %v889_v45 = vsel %vm888_vm12, %v1143_v39, %v885_v44 }
 0x7bc   : > { %v890_v46 = vmul.f32 %v889_v45, %v873_v33 }
 0x7be   : > { %v891_v47 = vmul.f32 %v1118_v10, %v890_v46 }
 0x7c0   : > { %v892_v48 = vadd.f32 %v1119_v12, %v891_v47 }
 0x7c2   : > { %893 = vst.msk [vmem:[%s394_s25] sm:$0xff] %vm422_vm0, %v892_v48 }
 0x7c3   : > { %1201 = shalt.err (!%p1198_p8)
}
 0x7c4   : > { %1059 = dma.vmem_to_hbm [thread:$0]  (%p1352_p5), %s908_s29, 128, %s910_s30, %s895_s21  }
 0x7c5 PF: > { %p1071_p9 = scmp.ge.s32.totalorder %s1240_s20, 2  ;;  %s921_s14 = sand.u32 1, %s1228_s17  }
 0x7c6   : > { %s922_s25 = scalar_lea.sflag [#allocation4], %s921_s14 }
 0x7c7   : > { %p1066_p10 = pnand %p1071_p9, %p1356_p6 }
 0x7c9   : > { %p1067_p11 = pneg %p1066_p10 }
 0x7cb   : > { %1223 = dma.done.wait (%p1067_p11), %s922_s25, 128  }
 0x7cc   : > { %1225 = vsyncadd (%p1067_p11), %s922_s25, 4294967168  ;;  %p22_p12 = scmp.ge.s32.totalorder %s1339_s23, 4   ;;  %s1519_s17 = smov %s1232_s18 }
 0x7cd   : > { %s1520_s18 = smov %s1236_s19  ;;  %s1521_s19 = smov %s1350_s26 }
 0x7ce   : > { %s1522_s20 = smov %s1339_s23  ;;  %24 = sbr.rel (!%p22_p12) target bundleno = 6 (0x6), region = 104 }
 0x7d3   :  { %928 = vsyncpa [#allocation3], 1 }
 0x7d4   :  { %930 = vsyncpa [#allocation3 + $0x1], 1 }
 0x7d5   :  { %931 = vsyncpa [#allocation4], 1 }
 0x7d6   :  { %933 = vsyncpa [#allocation4 + $0x1], 1 }

</bundles_post_ra>
